<compile_context>
chip_gen: v5e
topology: v5e:2x2
jax: 0.10.0
libtpu: 0.0.40
codegen_flags: <defaults>
</compile_context>

<pallas_src>
import jax
import jax.numpy as jnp
from jax.experimental import pallas as pl
from jax.experimental.pallas import tpu as pltpu


# --------------------------------------------------------------------------- kernels

def _score_kernel_mxu(items_ref, user_ref, o_ref):
    """Aligned path (D % 128 == 0).

    items_ref: (TB, TN, D)  -- item features (column-restricted DMA of x).
    user_ref : (TB, UR, D)  -- user columns of x, item-rows [0, UR); row 0 is the
                               true user vector x[b, 0, D:2D].
    o_ref    : (TB, 1, TN)  -- lane-dense scores.
    """
    # Batched q@k^T on the MXU: contract over D, batch over TB.  Accumulate in f32.
    scores = jnp.einsum(
        "bud,bnd->bun", user_ref[...], items_ref[...],
        preferred_element_type=jnp.float32)               # (TB, UR, TN)
    # Only item-row 0 of the small q-side carries the user vector; keep it.
    o_ref[...] = scores[:, 0:1, :].astype(o_ref.dtype)


def _score_kernel_vpu(items_ref, user_ref, o_ref):
    """Fallback path (D % 128 != 0).

    items_ref: (TB, TN, 2D) -- full item rows of x.
    user_ref : (TB, 1, 2D)  -- user vector zero-padded to width 2D (so contracting
                               over the full width equals the D-wide dot product and
                               no lane-unaligned in-kernel slice is needed).
    o_ref    : (TB, TN, 1)
    """
    prod = items_ref[...].astype(jnp.float32) * user_ref[...].astype(jnp.float32)
    o_ref[...] = jnp.sum(prod, axis=-1, keepdims=True).astype(o_ref.dtype)


# --------------------------------------------------------------------------- sizing

def _vmem_capacity_bytes():
    """Physical VMEM of the local TPU generation (fallback: v7x's 64 MiB)."""
    try:
        return int(pltpu.get_tpu_info().vmem_capacity_bytes)
    except Exception:
        return 64 * 1024 * 1024


def _pick_block_n(n, max_rows):
    """Item-row tile: multiple of 128 (<= max_rows), preferring an exact divisor of
    n; n itself when n <= 128 (full-extent blocks are always legal)."""
    if n <= 128:
        return n
    cap = max(128, min(n, (max_rows // 128) * 128))
    t = cap
    while t >= 128:
        if n % t == 0:
            return t
        t -= 128
    # No 128-multiple divisor of n: use the cap; pl.cdiv grid + Pallas block padding
    # handle the tail block (tail outputs only depend on tail inputs, so it is safe).
    return cap


# --------------------------------------------------------------------------- wrapper

def one_bit_user_preference_forward(x, num_items_features, *, block_b=None,
                                    block_n=None, tile_budget_bytes=None):
    """x: (B, N, 2*D) -> scores: (B, N, 1), matching the PyTorch module's forward."""
    B, N, F = x.shape
    D = num_items_features
    if F != 2 * D:
        raise ValueError("forward needs x.shape[-1] == 2 * num_items_features")

    itemsize = jnp.dtype(x.dtype).itemsize
    sublane = max(8, 32 // itemsize)          # native sublane tile: 8 f32 / 16 bf16
    aligned = (D % 128 == 0)
    W = D if aligned else F                   # columns DMA'd per item row
    row_bytes = W * itemsize

    # ---- generation-aware VMEM / per-buffer tile budgets -----------------------
    vmem_cap = _vmem_capacity_bytes()
    vmem_limit = min((vmem_cap * 3) // 4, 96 * 1024 * 1024)   # ~48 MiB v7x, 96 MiB v5e/v6e
    if tile_budget_bytes is None:
        # Budget for ONE items buffer (double-buffering doubles it); keep ample headroom.
        tile_budget_bytes = max(1 << 20, min(vmem_limit // 4, 16 * 1024 * 1024))

    # ---- tile sizes: batch tile first, then item-row tile from the remaining budget
    auto_b = block_b is None
    auto_n = block_n is None
    if auto_b:
        block_b = min(B, 8)
        if block_b * min(N, 128) * row_bytes > tile_budget_bytes:
            block_b = max(1, tile_budget_bytes // (min(N, 128) * row_bytes))
    if auto_n:
        max_rows = tile_budget_bytes // max(1, block_b * row_bytes)
        block_n = _pick_block_n(N, max_rows)
    if auto_b and auto_n and block_n >= N and B > block_b:
        # Whole item axis fits in one step: spend leftover budget on more batch rows.
        block_b = min(B, max(block_b, tile_budget_bytes // max(1, N * row_bytes)))
    if auto_b or auto_n:
        # v7x megacore: keep >= 2 grid steps along a parallel axis when possible.
        grid_steps = (-(-B // block_b)) * (-(-N // block_n))
        if grid_steps < 2:
            if auto_n and N >= 256:
                block_n = _pick_block_n(N, max(128, N // 2))
            elif auto_b and B >= 2:
                block_b = (B + 1) // 2

    grid = (pl.cdiv(B, block_b), pl.cdiv(N, block_n))

    if aligned:
        # Items: column-block 0 (first D columns).  User: item-row block 0 of
        # column-block 1 (columns [D, 2D)) -- read straight from x, no extra XLA op.
        ur = min(N, sublane)
        in_specs = [
            pl.BlockSpec((block_b, block_n, D), lambda b, n: (b, n, 0)),
            pl.BlockSpec((block_b, ur, D), lambda b, n: (b, 0, 1)),
        ]
        out_shape = jax.ShapeDtypeStruct((B, 1, N), x.dtype)
        out_spec = pl.BlockSpec((block_b, 1, block_n), lambda b, n: (b, 0, n))
        kernel = _score_kernel_mxu
        args = (x, x)
    else:
        # Zero-pad the tiny user vector to width 2D so the kernel contracts over the
        # full row width (identical result, no lane-unaligned in-kernel slice).
        user = x[:, 0:1, D:]                                              # (B, 1, D)
        user_pad = jnp.concatenate([user, jnp.zeros_like(user)], axis=-1)  # (B, 1, 2D)
        in_specs = [
            pl.BlockSpec((block_b, block_n, F), lambda b, n: (b, n, 0)),
            pl.BlockSpec((block_b, 1, F), lambda b, n: (b, 0, 0)),
        ]
        out_shape = jax.ShapeDtypeStruct((B, N, 1), x.dtype)
        out_spec = pl.BlockSpec((block_b, block_n, 1), lambda b, n: (b, n, 0))
        kernel = _score_kernel_vpu
        args = (x, user_pad)

    scores = pl.pallas_call(
        kernel,
        out_shape=out_shape,
        grid_spec=pl.GridSpec(
            grid=grid,
            in_specs=in_specs,
            out_specs=out_spec,
        ),
        compiler_params=pltpu.CompilerParams(
            dimension_semantics=("parallel", "parallel"),
            vmem_limit_bytes=int(vmem_limit),
        ),
    )(*args)

    # (B, 1, N) -> (B, N, 1) is a free (same-linear-order) reshape; (B, N, 1) is a no-op.
    return scores.reshape(B, N, 1)


# --------------------------------------------------------------------------- params / reference

def init_params(num_users, num_items_features, key):
    """Deterministic stand-ins for the module's parameters (forward() never uses them)."""
    # torch.nn.Linear(len(user_id_list), num_items_features, bias=False)
    linear_weight = jax.random.normal(key, (num_items_features, num_users), jnp.float32) * 0.02
    # one-hot "df": column i has a 1 at index (i - 1) (quirk of the PyTorch code).
    rows = (jnp.arange(num_users) - 1) % num_users
    one_hot = jnp.zeros((num_users, num_users), jnp.float32).at[rows, jnp.arange(num_users)].set(1.0)
    # TODO(synk): create_hot_bit_df returns a pandas DataFrame; represented here as a dense array.
    return {"linear_weight": linear_weight, "one_hot_user_mat": one_hot}


def _reference(x, D):
    items = x[:, :, :D].astype(jnp.float32)
    user = x[:, 0, D:].astype(jnp.float32)
    return jnp.einsum("bnd,bd->bn", items, user,
                      precision=jax.lax.Precision.HIGHEST)[..., None]


if __name__ == "__main__":
    key = jax.random.PRNGKey(0)
    k1, k2, k3, kp = jax.random.split(key, 4)

    # --- Main aligned path (D % 128 == 0): column-restricted DMA + MXU contraction.
    B, N, D = 8, 256, 128
    x = jax.random.normal(k1, (B, N, 2 * D), jnp.float32)
    params = init_params(num_users=D, num_items_features=D, key=kp)  # unused by forward (as in PyTorch)
    scores = jax.block_until_ready(one_bit_user_preference_forward(x, D))
    assert scores.shape == (B, N, 1)
    assert jnp.allclose(scores, _reference(x, D), atol=2e-2, rtol=2e-2)

    # --- bf16 inputs stay bf16 end to end (MXU accumulates in f32).
    xb = jax.random.normal(k2, (B, N, 2 * D), jnp.float32).astype(jnp.bfloat16)
    scores_b = jax.block_until_ready(one_bit_user_preference_forward(xb, D))
    assert scores_b.shape == (B, N, 1) and scores_b.dtype == jnp.bfloat16
    assert jnp.allclose(scores_b.astype(jnp.float32), _reference(xb, D), atol=0.25, rtol=0.05)

    # --- Unaligned fallback (D % 128 != 0): full-row DMA + zero-padded user on the VPU.
    B2, N2, D2 = 2, 8, 32
    x2 = jax.random.normal(k3, (B2, N2, 2 * D2), jnp.float32)
    scores2 = jax.block_until_ready(one_bit_user_preference_forward(x2, D2))
    assert scores2.shape == (B2, N2, 1)
    assert jnp.allclose(scores2, _reference(x2, D2), atol=1e-3, rtol=1e-3)

    print("KERNEL_OK")
</pallas_src>

<mosaic_0001>
module attributes {stable_mosaic.version = 11 : i64} {
  func.func @_score_kernel_mxu(%arg0: i32, %arg1: i32, %arg2: memref<8x128x128xf32, #tpu.memory_space<vmem>>, %arg3: memref<8x8x128xf32, #tpu.memory_space<vmem>>, %arg4: memref<8x1x128xf32, #tpu.memory_space<vmem>>) attributes {dimension_semantics = [#tpu.dimension_semantics<parallel>, #tpu.dimension_semantics<parallel>], iteration_bounds = array<i64: 1, 2>, scalar_prefetch = 0 : i64, scratch_operands = 0 : i64, tpu.core_type = #tpu.core_type<tc>, window_params = [{transform_indices = @transform_0, window_bounds = array<i64: 8, 128, 128>}, {transform_indices = @transform_1, window_bounds = array<i64: 8, 8, 128>}, {transform_indices = @transform_2, window_bounds = array<i64: 8, 1, 128>}]} {
    %c0 = arith.constant 0 : index
    %c0_0 = arith.constant 0 : index
    %c0_1 = arith.constant 0 : index
    %0 = vector.load %arg3[%c0, %c0_0, %c0_1] : memref<8x8x128xf32, #tpu.memory_space<vmem>>, vector<8x8x128xf32>
    %c0_2 = arith.constant 0 : index
    %c0_3 = arith.constant 0 : index
    %c0_4 = arith.constant 0 : index
    %1 = vector.load %arg2[%c0_2, %c0_3, %c0_4] : memref<8x128x128xf32, #tpu.memory_space<vmem>>, vector<8x128x128xf32>
    "tpu.trace_start"() <{level = 10 : i32, message = "bud,bnd->bun"}> : () -> ()
    %cst = arith.constant dense<0.000000e+00> : vector<8x8x128xf32>
    %2 = tpu.matmul %0, %1, %cst {dimension_numbers = #tpu.dot_dimension_numbers<[2], [2], [1], [1], [0, 0, 0, 1, 1, 1], [0], [0]>} : vector<8x8x128xf32>, vector<8x128x128xf32>, vector<8x8x128xf32> -> vector<8x8x128xf32>
    "tpu.trace_stop"() : () -> ()
    %3 = vector.extract_strided_slice %2 {offsets = [0, 0, 0], sizes = [8, 1, 128], strides = [1, 1, 1]} : vector<8x8x128xf32> to vector<8x1x128xf32>
    %c0_5 = arith.constant 0 : index
    %c0_6 = arith.constant 0 : index
    %c0_7 = arith.constant 0 : index
    %4 = vector.load %arg4[%c0_5, %c0_6, %c0_7] : memref<8x1x128xf32, #tpu.memory_space<vmem>>, vector<8x1x128xf32>
    tpu.vector_store %arg4[%c0_5, %c0_6, %c0_7], %3 {strides = array<i32>} : memref<8x1x128xf32, #tpu.memory_space<vmem>>, vector<8x1x128xf32>,
    return
  }
  func.func @transform_0(%arg0: i32, %arg1: i32) -> (i32, i32, i32) {
    %c0_i32 = arith.constant 0 : i32
    %c0_i32_0 = arith.constant 0 : i32
    return %arg0, %arg1, %c0_i32 : i32, i32, i32
  }
  func.func @transform_1(%arg0: i32, %arg1: i32) -> (i32, i32, i32) {
    %c0_i32 = arith.constant 0 : i32
    %c1_i32 = arith.constant 1 : i32
    %c0_i32_0 = arith.constant 0 : i32
    return %arg0, %c0_i32, %c1_i32 : i32, i32, i32
  }
  func.func @transform_2(%arg0: i32, %arg1: i32) -> (i32, i32, i32) {
    %c0_i32 = arith.constant 0 : i32
    %c0_i32_0 = arith.constant 0 : i32
    return %arg0, %c0_i32, %arg1 : i32, i32, i32
  }
}

</mosaic_0001>

<bundles_post_ra>
// kernel: tpu_custom_call.1
= control target key start
LH: loop header
LB: loop body
LE: loop exit
PB: predicated region body
PF: predicated region fallthrough
CT: control target
= control target key end

     0   :  { %7 = vsyncpa [#allocation3], 0  ;;  %s1207_s0 = inlined_call_operand.hbm [shape: f32[8,256,256], index: 0, kind: input, shape index: {}]   ;;  %s1208_s1 = inlined_call_operand.hbm [shape: f32[8,256,256], index: 1, kind: input, shape index: {}]   ;;  %s1209_s2 = inlined_call_operand.hbm [shape: f32[8,1,256], index: 2, kind: output, shape index: {}]  }
   0x1   :  { %9 = vsyncpa [#allocation3 + $0x1], 0 }
   0x2   :  { %10 = vsyncpa [#allocation6], 0 }
   0x3   :  { %11 = vsyncpa [#allocation4], 0 }
   0x4   :  { %13 = vsyncpa [#allocation4 + $0x1], 0  ;;  %s915_s9 = smov 0   ;;  %s917_s10 = smov 0  }
   0x5   :  { %s919_s11 = smov 0   ;;  %s921_s12 = smov 0  }
   0x6   :  { %s923_s13 = smov 0   ;;  %s925_s14 = smov 0  }
   0x7 LB: > { %s660_s15 = sadd.s32 4294967295, %s884_s14   ;;  %s661_s16 = sadd.s32 4294967294, %s884_s14   ;;  %s884_s14 = sphi %s925_s14, %s19_s14   ;;  %s880_s13 = sphi %s923_s13, %s1220_s13   ;;  %s876_s12 = sphi %s921_s12, %s1219_s12   ;;  %s872_s11 = sphi %s919_s11, %s1218_s11   ;;  %s868_s10 = sphi %s917_s10, %s1217_s10   ;;  %s864_s9 = sphi %s915_s9, %s1216_s9  }
   0x8   : > { %s28_s17 = sadd.s32 1, %s880_s13  ;;  %s40_s18 = sadd.s32 1, %s872_s11 }
   0x9   : > { %p29_p0 = scmp.ge.s32.totalorder %s28_s17, 2  ;;  %p47_p1 = scmp.ne.s32.totalorder %s872_s11, %s868_s10 }
   0xa   : > { %p48_p2 = scmp.eq.s32.totalorder %s884_s14, 0  ;;  %p53_p3 = scmp.ne.s32.totalorder %s868_s10, %s864_s9 }
   0xb   : > { %s1222_s17 = smov (%p29_p0, %s28_s17), 0  ;;  %p960_p5 = scmp.eq.s32.totalorder %s660_s15, 0 }
   0xc   : > { %p956_p4 = por %p48_p2, %p47_p1  ;;  %s36_s21 = ssub.s32 %s880_s13, %s1222_s17 }
   0xd   : > { %p105_p6 = scmp.eq.s32.totalorder %s660_s15, 1  ;;  %p38_p7 = scmp.eq.s32.totalorder %s36_s21, 0 }
   0xe   : > { %p968_p8 = por %p960_p5, %p53_p3  ;;  %p111_p10 = scmp.eq.s32.totalorder %s661_s16, 1 }
   0xf   : > { %p972_p9 = por %p105_p6, %p47_p1  ;;  %p662_p12 = scmp.ge.s32.totalorder %s884_s14, 1 }
  0x10   : > { %s977_s24 = scalar_select %p38_p7, %s872_s11, %s40_s18  }
  0x11   : > { %p979_p11 = por %p111_p10, %p53_p3  ;;  %p118_p13 = scmp.lt.s32.totalorder %s884_s14, 3 }
  0x12   : > { %s592_s28 = scalar_lea.hbm %s1208_s1, 8  ;;  %s886_s3 = smov [#allocation5]  }
  0x13   : > { %p988_p0 = pnand %p662_p12, %p118_p13  ;;  %s134_s30 = sshll.u32 %s592_s28, 4  ;;  %s135_s30 = int_to_ptr.hbm [resolvable:$true] %s134_s30 }
  0x14   : > { %s136_s4 = sshll.u32 %s886_s3, 4  ;;  %s887_s5 = smov 8192   ;;  %s137_s4 = int_to_ptr.vmem [resolvable:$true] %s136_s4 }
  0x15   : > { %p695_p1 = pneg %p988_p0  ;;  %s888_s6 = smov 128  }
  0x16   : > { %s889_s7 = smov 8   ;;  %p664_p3 = scmp.ge.s32.totalorder %s884_s14, 2 }
  0x17   : > { %p696_p2 = pnand %p695_p1, %p960_p5 }
  0x18   : > { %146 = sbr.rel (%p664_p3) target bundleno = 43 (0x2b), region = 20 }
  0x19   : > { %698 = dma.hbm_to_vmem [thread:$0]  (!%p696_p2), %s135_s30, 1024, %s137_s4, [#allocation6], %s887_s5, %s888_s6, %s889_s7  }
  0x1d   : > { %s150_s8 = sand.u32 1, %s872_s11   ;;  %s679_s15 = sshll.u32 %s880_s13, 8 }
  0x1e   : > { %s665_s16 = sshll.u32 %s150_s8, 10  ;;  %s163_s26 = scalar_lea.hbm %s1207_s0, %s679_s15 }
  0x1f   : > { %s682_s27 = scalar_select %p956_p4, [#allocation0], [#allocation10] }
  0x20   : > { %s176_s28 = sshll.u32 %s163_s26, 4  ;;  %s154_s30 = scalar_lea.vmem [#allocation2], %s665_s16  ;;  %s177_s28 = int_to_ptr.hbm [resolvable:$true] %s176_s28 }
  0x21   : > { %s178_s3 = sshll.u32 %s154_s30, 4  ;;  %s168_s4 = sld [smem:[%s682_s27]]   ;;  %s179_s3 = int_to_ptr.vmem [resolvable:$true] %s178_s3 }
  0x22   : > { %s890_s5 = smov 8192   ;;  %s891_s6 = smov 2048  }
  0x23   : > { %683 = sst [smem:[#allocation9]] (%p956_p4), %s890_s5  ;;  %s892_s7 = smov 16  }
  0x24   : > { %684 = sst [smem:[#allocation9 + $0x1]] (%p956_p4), %s891_s6  ;;  %s893_s15 = smov 256  }
  0x25   : > { %685 = sst [smem:[#allocation9 + $0x2]] (%p956_p4), %s892_s7  ;;  %s894_s16 = smov 128  }
  0x26   : > { %686 = sst [smem:[#allocation9 + $0x3]] (%p956_p4), %s893_s15  ;;  %s895_s26 = smov 8  }
  0x27   : > { %s669_s18 = sshll.u32 %s168_s4, 26  ;;  %687 = sst [smem:[#allocation9 + $0x4]] (%p956_p4), %s894_s16 }
  0x28   : > { %s670_s21 = sadd.s32 134217728, %s669_s18  ;;  %688 = sst [smem:[#allocation9 + $0x5]] (%p956_p4), %s895_s26 }
  0x29   : > { %s151_s27 = scalar_lea.sflag [#allocation3], %s150_s8  ;;  %s896_s30 = smov [#allocation8]  }
  0x2a   : > { %689 = dma.general (%p956_p4), %s177_s28, 16384, %s179_s3, %s151_s27, %s896_s30, [#allocation9], %s670_s21, 0  }
  0x2b PF: > { %203 = sbr.rel (%p988_p0) target bundleno = 317 (0x13d), region = 28  ;;  %s1023_s5 = sand.u32 (!%p988_p0), 1, %s868_s10  }
  0x2c   : > { %s672_s4 = sshll.u32 (!%p988_p0), %s1023_s5, 10  ;;  %s206_s6 = scalar_lea.sflag (!%p988_p0), [#allocation3], %s1023_s5 }
  0x2d   : > { %s1027_s7 = scalar_lea.vmem (!%p988_p0), [#allocation2], %s672_s4 }
  0x30   : > { %851 = dma.done.wait (%p968_p8), %s206_s6, 16384  }
  0x31   : > { %853 = vsyncadd (%p968_p8), %s206_s6, 4294950912 }
  0x32   : > { %855 = dma.done.wait (%p960_p5), [#allocation6], 1024  }
  0x33   : > { %857 = vsyncadd (%p960_p5), [#allocation6], 4294966272  ;;  %v295_v0 = vld [vmem:[%s1027_s7 + $0x178] sm:$0xff]  ;;  %v294_v4 = vld [vmem:[%s1027_s7 + $0x170] sm:$0xff]  ;;  %s674_s19 = sshll.u32 %s1023_s5, 3  ;;  %s557_s8 = scalar_lea.hbm %s1209_s2, %s876_s12 }
  0x34   : > { %v311_v1 = vld [vmem:[%s1027_s7 + $0x1f8] sm:$0xff]  ;;  %416 = vmatpush.xpose.msra.mxu2 %v295_v0  ;;  %v310_v5 = vld [vmem:[%s1027_s7 + $0x1f0] sm:$0xff]  ;;  %v293_v8 = vld [vmem:[%s1027_s7 + $0x168] sm:$0xff]  ;;  %s235_s20 = scalar_lea.vmem [#allocation7], %s674_s19  ;;  %s1170_s3 = sshll.u32 %s557_s8, 4  ;;  %s561_s3 = int_to_ptr.hbm [resolvable:$true] %s1170_s3 }
  0x35   : > { %436 = vmatpush.xpose.msra.mxu3 %v311_v1  ;;  %v263_v2 = vld [vmem:[%s1027_s7 + $0x78] sm:$0xff]  ;;  %v262_v6 = vld [vmem:[%s1027_s7 + $0x70] sm:$0xff]  ;;  %v309_v9 = vld [vmem:[%s1027_s7 + $0x1e8] sm:$0xff]  ;;  %s558_s28 = sshll.u32 %s235_s20, 4  ;;  %s545_s15 = scalar_lea.sflag [#allocation4], %s1023_s5  ;;  %s559_s28 = int_to_ptr.vmem [resolvable:$true] %s558_s28 }
  0x36   : > { %v279_v3 = vld [vmem:[%s1027_s7 + $0xf8] sm:$0xff]  ;;  %376 = vmatpush.xpose.msra.mxu0 %v263_v2  ;;  %v278_v7 = vld [vmem:[%s1027_s7 + $0xf0] sm:$0xff]  ;;  %v261_v10 = vld [vmem:[%s1027_s7 + $0x68] sm:$0xff]  ;;  %s812_s18 = sshra.s32 %s561_s3, 4  ;;  %s818_s26 = scalar_lea.hbm %s1209_s2, 16  ;;  %s813_s18 = int_to_ptr.hbm [resolvable:$true] %s812_s18 }
  0x37   : > { %396 = vmatpush.xpose.msra.mxu1 %v279_v3  ;;  %v277_v11 = vld [vmem:[%s1027_s7 + $0xe8] sm:$0xff]  ;;  %v292_v12 = vld [vmem:[%s1027_s7 + $0x160] sm:$0xff]  ;;  %v291_v16 = vld [vmem:[%s1027_s7 + $0x158] sm:$0xff]  ;;  %s814_s16 = scalar_lea.hbm %s813_s18, 8  ;;  %p819_p7 = scmp.lt.s32.totalorder %s813_s18, %s1209_s2 }
  0x38   : > { %417 = vmatpush.xpose.msra.mxu2 %v294_v4  ;;  %v308_v13 = vld [vmem:[%s1027_s7 + $0x1e0] sm:$0xff]  ;;  %v307_v17 = vld [vmem:[%s1027_s7 + $0x1d8] sm:$0xff]  ;;  %v290_v20 = vld [vmem:[%s1027_s7 + $0x150] sm:$0xff]  ;;  %p815_p4 = scmp.ne.s32.totalorder %s813_s18, %s814_s16  ;;  %p820_p8 = scmp.lt.s32.totalorder %s818_s26, %s814_s16 }
  0x39   : > { %437 = vmatpush.xpose.msra.mxu3 %v310_v5  ;;  %v260_v14 = vld [vmem:[%s1027_s7 + $0x60] sm:$0xff]  ;;  %v259_v18 = vld [vmem:[%s1027_s7 + $0x58] sm:$0xff]  ;;  %v306_v21 = vld [vmem:[%s1027_s7 + $0x1d0] sm:$0xff] }
  0x3a   : > { %377 = vmatpush.xpose.msra.mxu0 %v262_v6  ;;  %v276_v15 = vld [vmem:[%s1027_s7 + $0xe0] sm:$0xff]  ;;  %v275_v19 = vld [vmem:[%s1027_s7 + $0xd8] sm:$0xff]  ;;  %v258_v22 = vld [vmem:[%s1027_s7 + $0x50] sm:$0xff]  ;;  %p816_p5 = pnand %p815_p4, %p972_p9  ;;  %p821_p10 = por %p820_p8, %p819_p7 }
  0x3b   : > { %397 = vmatpush.xpose.msra.mxu1 %v278_v7  ;;  %v274_v23 = vld [vmem:[%s1027_s7 + $0xd0] sm:$0xff]  ;;  %v289_v24 = vld [vmem:[%s1027_s7 + $0x148] sm:$0xff]  ;;  %v288_v28 = vld [vmem:[%s1027_s7 + $0x140] sm:$0xff] }
  0x3c   : > { %418 = vmatpush.xpose.msra.mxu2 %v293_v8  ;;  %v305_v25 = vld [vmem:[%s1027_s7 + $0x1c8] sm:$0xff]  ;;  %v304_v29 = vld [vmem:[%s1027_s7 + $0x1c0] sm:$0xff]  ;;  %v287_v32 = vld [vmem:[%s1027_s7 + $0x138] sm:$0xff]  ;;  %p817_p6 = pneg %p816_p5 }
  0x3d   : > { %438 = vmatpush.xpose.msra.mxu3 %v309_v9  ;;  %v257_v26 = vld [vmem:[%s1027_s7 + $0x48] sm:$0xff]  ;;  %v256_v30 = vld [vmem:[%s1027_s7 + $0x40] sm:$0xff]  ;;  %v303_v33 = vld [vmem:[%s1027_s7 + $0x1b8] sm:$0xff] }
  0x3e   : > { %378 = vmatpush.xpose.msra.mxu0 %v261_v10  ;;  %v273_v27 = vld [vmem:[%s1027_s7 + $0xc8] sm:$0xff]  ;;  %v272_v31 = vld [vmem:[%s1027_s7 + $0xc0] sm:$0xff]  ;;  %v255_v34 = vld [vmem:[%s1027_s7 + $0x38] sm:$0xff]  ;;  %p822_p12 = pnand %p821_p10, %p817_p6 }
  0x3f   : > { %398 = vmatpush.xpose.msra.mxu1 %v277_v11  ;;  %v271_v35 = vld [vmem:[%s1027_s7 + $0xb8] sm:$0xff]  ;;  %v286_v36 = vld [vmem:[%s1027_s7 + $0x130] sm:$0xff]  ;;  %v285_v40 = vld [vmem:[%s1027_s7 + $0x128] sm:$0xff] }
  0x40   : > { %419 = vmatpush.xpose.msra.mxu2 %v292_v12  ;;  %v302_v37 = vld [vmem:[%s1027_s7 + $0x1b0] sm:$0xff]  ;;  %v301_v41 = vld [vmem:[%s1027_s7 + $0x1a8] sm:$0xff]  ;;  %v284_v44 = vld [vmem:[%s1027_s7 + $0x120] sm:$0xff] }
  0x41   : > { %439 = vmatpush.xpose.msra.mxu3 %v308_v13  ;;  %v254_v38 = vld [vmem:[%s1027_s7 + $0x30] sm:$0xff]  ;;  %v253_v42 = vld [vmem:[%s1027_s7 + $0x28] sm:$0xff]  ;;  %v300_v45 = vld [vmem:[%s1027_s7 + $0x1a0] sm:$0xff] }
  0x42   : > { %379 = vmatpush.xpose.msra.mxu0 %v260_v14  ;;  %v270_v39 = vld [vmem:[%s1027_s7 + $0xb0] sm:$0xff]  ;;  %v269_v43 = vld [vmem:[%s1027_s7 + $0xa8] sm:$0xff]  ;;  %v252_v46 = vld [vmem:[%s1027_s7 + $0x20] sm:$0xff] }
  0x43   : > { %399 = vmatpush.xpose.msra.mxu1 %v276_v15  ;;  %v268_v47 = vld [vmem:[%s1027_s7 + $0xa0] sm:$0xff]  ;;  %v283_v48 = vld [vmem:[%s1027_s7 + $0x118] sm:$0xff]  ;;  %v282_v52 = vld [vmem:[%s1027_s7 + $0x110] sm:$0xff] }
  0x44   : > { %420 = vmatpush.xpose.msra.mxu2 %v291_v16  ;;  %v299_v49 = vld [vmem:[%s1027_s7 + $0x198] sm:$0xff]  ;;  %v298_v53 = vld [vmem:[%s1027_s7 + $0x190] sm:$0xff]  ;;  %v281_v56 = vld [vmem:[%s1027_s7 + $0x108] sm:$0xff] }
  0x45   : > { %440 = vmatpush.xpose.msra.mxu3 %v307_v17  ;;  %v251_v50 = vld [vmem:[%s1027_s7 + $0x18] sm:$0xff]  ;;  %v250_v54 = vld [vmem:[%s1027_s7 + $0x10] sm:$0xff]  ;;  %v297_v57 = vld [vmem:[%s1027_s7 + $0x188] sm:$0xff] }
  0x46   : > { %380 = vmatpush.xpose.msra.mxu0 %v259_v18  ;;  %v267_v51 = vld [vmem:[%s1027_s7 + $0x98] sm:$0xff]  ;;  %v266_v55 = vld [vmem:[%s1027_s7 + $0x90] sm:$0xff]  ;;  %v249_v58 = vld [vmem:[%s1027_s7 + $0x8] sm:$0xff] }
  0x47   : > { %400 = vmatpush.xpose.msra.mxu1 %v275_v19  ;;  %v265_v59 = vld [vmem:[%s1027_s7 + $0x88] sm:$0xff]  ;;  %v280_v60 = vld [vmem:[%s1027_s7 + $0x100] sm:$0xff]  ;;  %v359_v62 = vld [vmem:[%s1027_s7 + $0x378] sm:$0xff] }
  0x48   : > { %421 = vmatpush.xpose.msra.mxu2 %v290_v20  ;;  %v296_v61 = vld [vmem:[%s1027_s7 + $0x180] sm:$0xff]  ;;  %v375_v63 = vld [vmem:[%s1027_s7 + $0x3f8] sm:$0xff]  ;;  %v358_v4 = vld [vmem:[%s1027_s7 + $0x370] sm:$0xff] }
  0x49   : > { %441 = vmatpush.xpose.msra.mxu3 %v306_v21  ;;  %v248_v0 = vld [vmem:[%s1027_s7] sm:$0xff]  ;;  %v327_v2 = vld [vmem:[%s1027_s7 + $0x278] sm:$0xff]  ;;  %v374_v5 = vld [vmem:[%s1027_s7 + $0x3f0] sm:$0xff] }
  0x4a   : > { %381 = vmatpush.xpose.msra.mxu0 %v258_v22  ;;  %v264_v1 = vld [vmem:[%s1027_s7 + $0x80] sm:$0xff]  ;;  %v343_v3 = vld [vmem:[%s1027_s7 + $0x2f8] sm:$0xff]  ;;  %v326_v6 = vld [vmem:[%s1027_s7 + $0x270] sm:$0xff] }
  0x4b   : > { %401 = vmatpush.xpose.msra.mxu1 %v274_v23  ;;  %v342_v7 = vld [vmem:[%s1027_s7 + $0x2f0] sm:$0xff]  ;;  %v357_v8 = vld [vmem:[%s1027_s7 + $0x368] sm:$0xff]  ;;  %v356_v12 = vld [vmem:[%s1027_s7 + $0x360] sm:$0xff] }
  0x4c   : > { %422 = vmatpush.xpose.msra.mxu2 %v289_v24  ;;  %v373_v9 = vld [vmem:[%s1027_s7 + $0x3e8] sm:$0xff]  ;;  %v372_v13 = vld [vmem:[%s1027_s7 + $0x3e0] sm:$0xff]  ;;  %v355_v16 = vld [vmem:[%s1027_s7 + $0x358] sm:$0xff] }
  0x4d   : > { %442 = vmatpush.xpose.msra.mxu3 %v305_v25  ;;  %v325_v10 = vld [vmem:[%s1027_s7 + $0x268] sm:$0xff]  ;;  %v324_v14 = vld [vmem:[%s1027_s7 + $0x260] sm:$0xff]  ;;  %v371_v17 = vld [vmem:[%s1027_s7 + $0x3d8] sm:$0xff] }
  0x4e   : > { %382 = vmatpush.xpose.msra.mxu0 %v257_v26  ;;  %v341_v11 = vld [vmem:[%s1027_s7 + $0x2e8] sm:$0xff]  ;;  %v340_v15 = vld [vmem:[%s1027_s7 + $0x2e0] sm:$0xff]  ;;  %v323_v18 = vld [vmem:[%s1027_s7 + $0x258] sm:$0xff] }
  0x4f   : > { %402 = vmatpush.xpose.msra.mxu1 %v273_v27  ;;  %v339_v19 = vld [vmem:[%s1027_s7 + $0x2d8] sm:$0xff]  ;;  %v354_v20 = vld [vmem:[%s1027_s7 + $0x350] sm:$0xff]  ;;  %v353_v25 = vld [vmem:[%s1027_s7 + $0x348] sm:$0xff] }
  0x50   : > { %423 = vmatpush.xpose.msra.mxu2 %v288_v28  ;;  %v370_v21 = vld [vmem:[%s1027_s7 + $0x3d0] sm:$0xff]  ;;  %v369_v26 = vld [vmem:[%s1027_s7 + $0x3c8] sm:$0xff]  ;;  %v243_v27 = vld [vmem:[#allocation5 + $0x18] sm:$0xff] }
  0x51   : > { %443 = vmatpush.xpose.msra.mxu3 %v304_v29  ;;  %v322_v22 = vld [vmem:[%s1027_s7 + $0x250] sm:$0xff]  ;;  %v321_v28 = vld [vmem:[%s1027_s7 + $0x248] sm:$0xff] }
  0x52   : > { %383 = vmatpush.xpose.msra.mxu0 %v256_v30  ;;  %v338_v23 = vld [vmem:[%s1027_s7 + $0x2d0] sm:$0xff]  ;;  %v337_v29 = vld [vmem:[%s1027_s7 + $0x2c8] sm:$0xff]  ;;  %v352_v30 = vld [vmem:[%s1027_s7 + $0x340] sm:$0xff] }
  0x53   : > { %403 = vmatpush.xpose.msra.mxu1 %v272_v31  ;;  %v242_v24 = vld [vmem:[#allocation5 + $0x10] sm:$0xff]  ;;  %v368_v31 = vld [vmem:[%s1027_s7 + $0x3c0] sm:$0xff] }
  0x54   : > { %424 = vmatpush.xpose.msra.mxu2 %v287_v32  ;;  %v320_v32 = vld [vmem:[%s1027_s7 + $0x240] sm:$0xff] }
  0x55   : > { %444 = vmatpush.xpose.msra.mxu3 %v303_v33  ;;  %v336_v33 = vld [vmem:[%s1027_s7 + $0x2c0] sm:$0xff] }
  0x56   : > { %384 = vmatpush.xpose.msra.mxu0 %v255_v34  ;;  %v240_v34 = vld [vmem:[#allocation5] sm:$0xff] }
  0x57   : > { %404 = vmatpush.xpose.msra.mxu1 %v271_v35  ;;  %v241_v35 = vld [vmem:[#allocation5 + $0x8] sm:$0xff] }
  0x58   : > { %425 = vmatpush.xpose.msra.mxu2 %v286_v36  ;;  %v351_v36 = vld [vmem:[%s1027_s7 + $0x338] sm:$0xff] }
  0x59   : > { %445 = vmatpush.xpose.msra.mxu3 %v302_v37  ;;  %v367_v37 = vld [vmem:[%s1027_s7 + $0x3b8] sm:$0xff] }
  0x5a   : > { %385 = vmatpush.xpose.msra.mxu0 %v254_v38  ;;  %v319_v38 = vld [vmem:[%s1027_s7 + $0x238] sm:$0xff] }
  0x5b   : > { %405 = vmatpush.xpose.msra.mxu1 %v270_v39  ;;  %v335_v39 = vld [vmem:[%s1027_s7 + $0x2b8] sm:$0xff] }
  0x5c   : > { %426 = vmatpush.xpose.msra.mxu2 %v285_v40  ;;  %v350_v40 = vld [vmem:[%s1027_s7 + $0x330] sm:$0xff] }
  0x5d   : > { %446 = vmatpush.xpose.msra.mxu3 %v301_v41  ;;  %v366_v41 = vld [vmem:[%s1027_s7 + $0x3b0] sm:$0xff] }
  0x5e   : > { %386 = vmatpush.xpose.msra.mxu0 %v253_v42  ;;  %v318_v42 = vld [vmem:[%s1027_s7 + $0x230] sm:$0xff] }
  0x5f   : > { %406 = vmatpush.xpose.msra.mxu1 %v269_v43  ;;  %v334_v43 = vld [vmem:[%s1027_s7 + $0x2b0] sm:$0xff] }
  0x60   : > { %427 = vmatpush.xpose.msra.mxu2 %v284_v44  ;;  %v349_v44 = vld [vmem:[%s1027_s7 + $0x328] sm:$0xff] }
  0x61   : > { %447 = vmatpush.xpose.msra.mxu3 %v300_v45  ;;  %v365_v45 = vld [vmem:[%s1027_s7 + $0x3a8] sm:$0xff] }
  0x62   : > { %387 = vmatpush.xpose.msra.mxu0 %v252_v46  ;;  %v317_v46 = vld [vmem:[%s1027_s7 + $0x228] sm:$0xff] }
  0x63   : > { %407 = vmatpush.xpose.msra.mxu1 %v268_v47  ;;  %v333_v47 = vld [vmem:[%s1027_s7 + $0x2a8] sm:$0xff] }
  0x64   : > { %428 = vmatpush.xpose.msra.mxu2 %v283_v48  ;;  %v348_v48 = vld [vmem:[%s1027_s7 + $0x320] sm:$0xff] }
  0x65   : > { %448 = vmatpush.xpose.msra.mxu3 %v299_v49  ;;  %v364_v49 = vld [vmem:[%s1027_s7 + $0x3a0] sm:$0xff] }
  0x66   : > { %388 = vmatpush.xpose.msra.mxu0 %v251_v50  ;;  %v316_v50 = vld [vmem:[%s1027_s7 + $0x220] sm:$0xff] }
  0x67   : > { %408 = vmatpush.xpose.msra.mxu1 %v267_v51  ;;  %v332_v51 = vld [vmem:[%s1027_s7 + $0x2a0] sm:$0xff] }
  0x68   : > { %429 = vmatpush.xpose.msra.mxu2 %v282_v52  ;;  %v347_v52 = vld [vmem:[%s1027_s7 + $0x318] sm:$0xff] }
  0x69   : > { %449 = vmatpush.xpose.msra.mxu3 %v298_v53  ;;  %v363_v53 = vld [vmem:[%s1027_s7 + $0x398] sm:$0xff] }
  0x6a   : > { %389 = vmatpush.xpose.msra.mxu0 %v250_v54  ;;  %v315_v54 = vld [vmem:[%s1027_s7 + $0x218] sm:$0xff] }
  0x6b   : > { %409 = vmatpush.xpose.msra.mxu1 %v266_v55  ;;  %v331_v55 = vld [vmem:[%s1027_s7 + $0x298] sm:$0xff] }
  0x6c   : > { %430 = vmatpush.xpose.msra.mxu2 %v281_v56  ;;  %v346_v56 = vld [vmem:[%s1027_s7 + $0x310] sm:$0xff] }
  0x6d   : > { %450 = vmatpush.xpose.msra.mxu3 %v297_v57  ;;  %v362_v57 = vld [vmem:[%s1027_s7 + $0x390] sm:$0xff] }
  0x6e   : > { %390 = vmatpush.xpose.msra.mxu0 %v249_v58  ;;  %v314_v58 = vld [vmem:[%s1027_s7 + $0x210] sm:$0xff] }
  0x6f   : > { %410 = vmatpush.xpose.msra.mxu1 %v265_v59  ;;  %v330_v59 = vld [vmem:[%s1027_s7 + $0x290] sm:$0xff] }
  0x70   : > { %431 = vmatpush.xpose.msra.mxu2 %v280_v60  ;;  %v345_v60 = vld [vmem:[%s1027_s7 + $0x308] sm:$0xff] }
  0x71   : > { %451 = vmatpush.xpose.msra.mxu3 %v296_v61  ;;  %v361_v61 = vld [vmem:[%s1027_s7 + $0x388] sm:$0xff] }
  0x72   : > { %391 = vmatpush.xpose.msra.mxu0 %v248_v0  ;;  %v344_v0 = vld [vmem:[%s1027_s7 + $0x300] sm:$0xff] }
  0x73   : > { %411 = vmatpush.xpose.msra.mxu1 %v264_v1  ;;  %432 = vmatmul.f32.vlgmr.msra.gmra.mxu2 %v242_v24  ;;  %v360_v1 = vld [vmem:[%s1027_s7 + $0x380] sm:$0xff] }
  0x74   : > { %496 = vmatpush.xpose.msrb.mxu2 %v359_v62  ;;  %452 = vmatmul.f32.vlgmr.msra.gmra.mxu3 %v243_v27  ;;  %v313_v62 = vld [vmem:[%s1027_s7 + $0x208] sm:$0xff] }
  0x75   : > { %516 = vmatpush.xpose.msrb.mxu3 %v375_v63  ;;  %392 = vmatmul.f32.vlgmr.msra.gmra.mxu0 %v240_v34  ;;  %v329_v63 = vld [vmem:[%s1027_s7 + $0x288] sm:$0xff] }
  0x76   : > { %456 = vmatpush.xpose.msrb.mxu0 %v327_v2  ;;  %412 = vmatmul.f32.vlgmr.msra.gmra.mxu1 %v241_v35  ;;  %v312_v2 = vld [vmem:[%s1027_s7 + $0x200] sm:$0xff] }
  0x77   : > { %476 = vmatpush.xpose.msrb.mxu1 %v343_v3  ;;  %v328_v3 = vld [vmem:[%s1027_s7 + $0x280] sm:$0xff] }
  0x78   : > { %497 = vmatpush.xpose.msrb.mxu2 %v358_v4  ;;  %v246_v4 = vld [vmem:[#allocation5 + $0x30] sm:$0xff] }
  0x79   : > { %517 = vmatpush.xpose.msrb.mxu3 %v374_v5  ;;  %v247_v5 = vld [vmem:[#allocation5 + $0x38] sm:$0xff] }
  0x7a   : > { %457 = vmatpush.xpose.msrb.mxu0 %v326_v6  ;;  %v244_v6 = vld [vmem:[#allocation5 + $0x20] sm:$0xff] }
  0x7b   : > { %477 = vmatpush.xpose.msrb.mxu1 %v342_v7  ;;  %v245_v7 = vld [vmem:[#allocation5 + $0x28] sm:$0xff] }
  0x7c   : > { %498 = vmatpush.xpose.msrb.mxu2 %v357_v8 }
  0x7d   : > { %518 = vmatpush.xpose.msrb.mxu3 %v373_v9 }
  0x7e   : > { %458 = vmatpush.xpose.msrb.mxu0 %v325_v10 }
  0x7f   : > { %478 = vmatpush.xpose.msrb.mxu1 %v341_v11 }
  0x80   : > { %499 = vmatpush.xpose.msrb.mxu2 %v356_v12 }
  0x81   : > { %519 = vmatpush.xpose.msrb.mxu3 %v372_v13 }
  0x82   : > { %459 = vmatpush.xpose.msrb.mxu0 %v324_v14 }
  0x83   : > { %479 = vmatpush.xpose.msrb.mxu1 %v340_v15 }
  0x84   : > { %500 = vmatpush.xpose.msrb.mxu2 %v355_v16 }
  0x85   : > { %520 = vmatpush.xpose.msrb.mxu3 %v371_v17 }
  0x86   : > { %460 = vmatpush.xpose.msrb.mxu0 %v323_v18 }
  0x87   : > { %480 = vmatpush.xpose.msrb.mxu1 %v339_v19 }
  0x88   : > { %501 = vmatpush.xpose.msrb.mxu2 %v354_v20 }
  0x89   : > { %521 = vmatpush.xpose.msrb.mxu3 %v370_v21 }
  0x8a   : > { %461 = vmatpush.xpose.msrb.mxu0 %v322_v22 }
  0x8b   : > { %481 = vmatpush.xpose.msrb.mxu1 %v338_v23 }
  0x8c   : > { %502 = vmatpush.xpose.msrb.mxu2 %v353_v25 }
  0x8d   : > { %522 = vmatpush.xpose.msrb.mxu3 %v369_v26 }
  0x8e   : > { %462 = vmatpush.xpose.msrb.mxu0 %v321_v28 }
  0x8f   : > { %482 = vmatpush.xpose.msrb.mxu1 %v337_v29 }
  0x90   : > { %503 = vmatpush.xpose.msrb.mxu2 %v352_v30 }
  0x91   : > { %523 = vmatpush.xpose.msrb.mxu3 %v368_v31 }
  0x92   : > { %463 = vmatpush.xpose.msrb.mxu0 %v320_v32 }
  0x93   : > { %483 = vmatpush.xpose.msrb.mxu1 %v336_v33 }
  0x94   : > { %504 = vmatpush.xpose.msrb.mxu2 %v351_v36 }
  0x95   : > { %524 = vmatpush.xpose.msrb.mxu3 %v367_v37 }
  0x96   : > { %464 = vmatpush.xpose.msrb.mxu0 %v319_v38 }
  0x97   : > { %484 = vmatpush.xpose.msrb.mxu1 %v335_v39 }
  0x98   : > { %505 = vmatpush.xpose.msrb.mxu2 %v350_v40 }
  0x99   : > { %525 = vmatpush.xpose.msrb.mxu3 %v366_v41 }
  0x9a   : > { %465 = vmatpush.xpose.msrb.mxu0 %v318_v42 }
  0x9b   : > { %485 = vmatpush.xpose.msrb.mxu1 %v334_v43 }
  0x9c   : > { %506 = vmatpush.xpose.msrb.mxu2 %v349_v44 }
  0x9d   : > { %526 = vmatpush.xpose.msrb.mxu3 %v365_v45 }
  0x9e   : > { %466 = vmatpush.xpose.msrb.mxu0 %v317_v46 }
  0x9f   : > { %486 = vmatpush.xpose.msrb.mxu1 %v333_v47 }
  0xa0   : > { %507 = vmatpush.xpose.msrb.mxu2 %v348_v48 }
  0xa1   : > { %527 = vmatpush.xpose.msrb.mxu3 %v364_v49 }
  0xa2   : > { %467 = vmatpush.xpose.msrb.mxu0 %v316_v50 }
  0xa3   : > { %487 = vmatpush.xpose.msrb.mxu1 %v332_v51 }
  0xa4   : > { %508 = vmatpush.xpose.msrb.mxu2 %v347_v52 }
  0xa5   : > { %528 = vmatpush.xpose.msrb.mxu3 %v363_v53 }
  0xa6   : > { %468 = vmatpush.xpose.msrb.mxu0 %v315_v54 }
  0xa7   : > { %488 = vmatpush.xpose.msrb.mxu1 %v331_v55 }
  0xa8   : > { %509 = vmatpush.xpose.msrb.mxu2 %v346_v56 }
  0xa9   : > { %529 = vmatpush.xpose.msrb.mxu3 %v362_v57 }
  0xaa   : > { %469 = vmatpush.xpose.msrb.mxu0 %v314_v58 }
  0xab   : > { %489 = vmatpush.xpose.msrb.mxu1 %v330_v59 }
  0xac   : > { %510 = vmatpush.xpose.msrb.mxu2 %v345_v60 }
  0xad   : > { %530 = vmatpush.xpose.msrb.mxu3 %v361_v61 }
  0xae   : > { %470 = vmatpush.xpose.msrb.mxu0 %v313_v62 }
  0xaf   : > { %490 = vmatpush.xpose.msrb.mxu1 %v329_v63 }
  0xb0   : > { %511 = vmatpush.xpose.msrb.mxu2 %v344_v0 }
  0xb1   : > { %531 = vmatpush.xpose.msrb.mxu3 %v360_v1 }
  0xb2   : > { %471 = vmatpush.xpose.msrb.mxu0 %v312_v2 }
  0xb3   : > { %491 = vmatpush.xpose.msrb.mxu1 %v328_v3  ;;  %512 = vmatmul.f32.vlgmr.msrb.gmra.mxu2 %v246_v4 }
  0xb4   : > { %532 = vmatmul.f32.vlgmr.msrb.gmra.mxu3 %v247_v5 }
  0xb5   : > { %472 = vmatmul.f32.vlgmr.msrb.gmra.mxu0 %v244_v6 }
  0xb6   : > { %492 = vmatmul.f32.vlgmr.msrb.gmra.mxu1 %v245_v7 }
  0xf2   : > { %v393_v9 = vpop.f32.mrf.mxu0 }
  0xf3   : > { %v413_v10 = vpop.f32.mrf.mxu1  ;;  %536 = vst [vmem:[%s235_s20] sm:$0x1] %v393_v9 }
  0xf4   : > { %537 = vst [vmem:[%s235_s20 + $0x1] sm:$0x1] %v413_v10 }
  0xf6   : > { %v433_v8 = vpop.f32.mrf.mxu2 }
  0xf7   : > { %538 = vst [vmem:[%s235_s20 + $0x2] sm:$0x1] %v433_v8  ;;  %v453_v11 = vpop.f32.mrf.mxu3 }
  0xf8   : > { %539 = vst [vmem:[%s235_s20 + $0x3] sm:$0x1] %v453_v11 }
 0x132   : > { %v473_v12 = vpop.f32.mrf.mxu0 }
 0x133   : > { %v493_v13 = vpop.f32.mrf.mxu1  ;;  %540 = vst [vmem:[%s235_s20 + $0x4] sm:$0x1] %v473_v12 }
 0x134   : > { %541 = vst [vmem:[%s235_s20 + $0x5] sm:$0x1] %v493_v13 }
 0x136   : > { %v513_v14 = vpop.f32.mrf.mxu2 }
 0x137   : > { %v533_v15 = vpop.f32.mrf.mxu3  ;;  %542 = vst [vmem:[%s235_s20 + $0x6] sm:$0x1] %v513_v14 }
 0x138   : > { %543 = vst [vmem:[%s235_s20 + $0x7] sm:$0x1] %v533_v15 }
 0x139   : > { %825 = shalt.err (!%p822_p12)
}
 0x13a   : > { %s897_s5 = smov 16   ;;  %s898_s4 = smov 32  }
 0x13b   : > { %s899_s6 = smov 1  }
 0x13c   : > { %693 = dma.vmem_to_hbm [thread:$0]  (%p972_p9), %s559_s28, 128, %s561_s3, %s545_s15, %s897_s5, %s898_s4, %s899_s6  }
 0x13d PF: > { %s575_s7 = sand.u32 1, %s864_s9   ;;  %p700_p13 = pnand %p664_p3, %p979_p11 }
 0x13e   : > { %s576_s19 = scalar_lea.sflag [#allocation4], %s575_s7 }
 0x13f   : > { %p701_p0 = pneg %p700_p13 }
 0x141   : > { %859 = dma.done.wait (%p701_p0), %s576_s19, 128  }
 0x142   : > { %861 = vsyncadd (%p701_p0), %s576_s19, 4294967168  ;;  %s19_s14 = sadd.s32 1, %s884_s14   ;;  %s1216_s9 = smov %s868_s10 }
 0x143   : > { %p16_p1 = scmp.ge.s32.totalorder %s19_s14, 4   ;;  %s1217_s10 = smov %s872_s11 }
 0x144   : > { %s1218_s11 = smov %s977_s24  ;;  %s1219_s12 = smov %s880_s13 }
 0x145   : > { %s1220_s13 = smov %s1222_s17  ;;  %18 = sbr.rel (!%p16_p1) target bundleno = 7 (0x7), region = 83 }
 0x14a   :  { %582 = vsyncpa [#allocation3], 1 }
 0x14b   :  { %584 = vsyncpa [#allocation3 + $0x1], 1 }
 0x14c   :  { %585 = vsyncpa [#allocation6], 1 }
 0x14d   :  { %586 = vsyncpa [#allocation4], 1 }
 0x14e   :  { %588 = vsyncpa [#allocation4 + $0x1], 1 }

</bundles_post_ra>
